<compile_context>
chip_gen: v6e
topology: v6e:2x2x1
jax: 0.10.0
libtpu: 0.0.40
codegen_flags: <defaults>
</compile_context>

<pallas_src>
import math

import jax
import jax.numpy as jnp
from jax.experimental import pallas as pl
from jax.experimental.pallas import tpu as pltpu

EPS = 1e-6
_MAX_PACKED_WIDTH = 512  # cap k*F so the (k*F, k*F) segment matmul stays << DMA time


def _seg_sum(v, m_bf16):
    """Segmented row-sum of v, broadcast back to every lane of its segment.

    v: (rows, k*F) f32; m_bf16: (k*F, k*F) block-diagonal 0/1 matrix (exact in bf16).
    Manual two-term bf16 split keeps ~f32 accuracy with plain bf16 MXU matmuls
    (f32 accumulation), independent of default matmul-precision settings.
    """
    hi = v.astype(jnp.bfloat16)
    lo = (v - hi.astype(jnp.float32)).astype(jnp.bfloat16)
    s = jnp.dot(hi, m_bf16, preferred_element_type=jnp.float32)
    return s + jnp.dot(lo, m_bf16, preferred_element_type=jnp.float32)


def _make_kernel(k, f):
    inv_f = 1.0 / f
    inv_ddof = 1.0 / max(f - 1, 1)  # torch.std is unbiased (N-1); guard degenerate F==1

    if k == 1:
        def kernel(x_ref, g_ref, b_ref, o_ref):
            x = x_ref[...].astype(jnp.float32)                 # (rows, F)
            mean = jnp.sum(x, axis=-1, keepdims=True) * inv_f
            d = x - mean
            var = jnp.sum(d * d, axis=-1, keepdims=True) * inv_ddof
            std = jnp.sqrt(var)
            inv = pl.reciprocal(std + EPS)   # exact; approx=True breaks 1e-5 parity
            y = g_ref[...].astype(jnp.float32) * (d * inv) + b_ref[...].astype(jnp.float32)
            o_ref[...] = y.astype(o_ref.dtype)
    else:
        def kernel(x_ref, g_ref, b_ref, m_ref, o_ref):
            x = x_ref[...].astype(jnp.float32)                 # (rows, k*F), lane-dense
            m = m_ref[...]                                     # (k*F, k*F) bf16 block-diag
            mean = _seg_sum(x, m) * inv_f                      # per-logical-row mean
            d = x - mean
            var = _seg_sum(d * d, m) * inv_ddof
            std = jnp.sqrt(var)
            inv = pl.reciprocal(std + EPS)
            y = g_ref[...].astype(jnp.float32) * (d * inv) + b_ref[...].astype(jnp.float32)
            o_ref[...] = y.astype(o_ref.dtype)

    return kernel


def _vmem_budget():
    """(vmem_limit_bytes, target_block_bytes) derived from the running generation."""
    cap = 64 * 1024 * 1024  # conservative fallback = v7x per-TensorCore VMEM
    try:
        cap = int(getattr(pltpu.get_tpu_info(), "vmem_capacity_bytes", cap)) or cap
    except Exception:
        pass
    limit = min((cap * 3) // 4, 64 * 1024 * 1024)          # 48 MiB v7x, 64 MiB v5e/v6e
    # 4x block (double-buffered in+out) + ~4-5x block of live f32 intermediates.
    target = max(2 * 1024 * 1024, min(8 * 1024 * 1024, limit // 12))
    return limit, target


def _choose_pack(n_rows, features):
    """Lane-packing factor k so the kernel's minor dim k*F is a multiple of 128."""
    if features <= 0 or features % 128 == 0:
        return 1
    k = 128 // math.gcd(features, 128)
    if k > 1 and k * features <= _MAX_PACKED_WIDTH and n_rows % k == 0:
        return k
    return 1  # fall back to the plain (lane-masked) path


def _choose_tile_rows(n_rows, width, itemsize, target_block_bytes):
    """Bytes-targeted row tile (no hard row cap), rounded to the sublane multiple."""
    mult = {4: 8, 2: 16}.get(itemsize, 32)
    if n_rows <= mult:
        return max(1, n_rows)                              # one block == full row extent
    rows = max(mult, target_block_bytes // max(1, width * itemsize))
    rows = min(rows, pl.cdiv(n_rows, mult) * mult)         # partial last block is masked
    rows = max(mult, (rows // mult) * mult)
    return int(rows)


def layer_norm(x, gamma, beta):
    """x: (..., F); gamma, beta: (F,). Normalizes over the last axis."""
    orig_shape = x.shape
    f = int(orig_shape[-1])
    x2 = x.reshape(-1, f)
    r = x2.shape[0]

    k = _choose_pack(r, f)
    kf = k * f
    rp = r // k
    xp = x2.reshape(rp, kf)  # free row-major view when k > 1; identity when k == 1

    if k > 1:
        g_row = jnp.tile(gamma.reshape(1, f), (1, k))
        b_row = jnp.tile(beta.reshape(1, f), (1, k))
    else:
        g_row = gamma.reshape(1, f)
        b_row = beta.reshape(1, f)

    vmem_limit, target_block_bytes = _vmem_budget()
    tile_rows = _choose_tile_rows(rp, kf, x2.dtype.itemsize, target_block_bytes)
    grid = (pl.cdiv(rp, tile_rows),)

    inputs = [xp, g_row, b_row]
    in_specs = [
        pl.BlockSpec((tile_rows, kf), lambda i: (i, 0)),
        pl.BlockSpec((1, kf), lambda i: (0, 0)),
        pl.BlockSpec((1, kf), lambda i: (0, 0)),
    ]
    if k > 1:
        # Block-diagonal 0/1 segment matrix; constant block index -> stays resident.
        seg = jnp.arange(kf, dtype=jnp.int32) // f
        m = (seg[:, None] == seg[None, :]).astype(jnp.bfloat16)
        inputs.append(m)
        in_specs.append(pl.BlockSpec((kf, kf), lambda i: (0, 0)))

    out = pl.pallas_call(
        _make_kernel(k, f),
        out_shape=jax.ShapeDtypeStruct((rp, kf), x.dtype),
        grid_spec=pltpu.PrefetchScalarGridSpec(
            num_scalar_prefetch=0,
            grid=grid,
            in_specs=in_specs,
            out_specs=pl.BlockSpec((tile_rows, kf), lambda i: (i, 0)),
        ),
        compiler_params=pltpu.CompilerParams(
            # Rows are fully independent -> megacore / multi-TC sharding.
            dimension_semantics=("parallel",),
            vmem_limit_bytes=vmem_limit,
        ),
    )(*inputs)

    return out.reshape(orig_shape)


def layer_norm_reference(x, gamma, beta):
    x32 = x.astype(jnp.float32)
    mean = jnp.mean(x32, axis=-1, keepdims=True)
    std = jnp.std(x32, axis=-1, keepdims=True, ddof=1)
    return (gamma * (x32 - mean) / (std + EPS) + beta).astype(x.dtype)


if __name__ == "__main__":
    key = jax.random.PRNGKey(0)
    batch, seq, hidden = 2, 8, 32
    x = jax.random.normal(key, (batch, seq, hidden), dtype=jnp.float32)

    # Deterministic parameters, matching nn.Parameter(torch.ones/zeros(features)).
    gamma = jnp.ones((hidden,), dtype=jnp.float32)
    beta = jnp.zeros((hidden,), dtype=jnp.float32)

    y = layer_norm(x, gamma, beta)
    y = jax.block_until_ready(y)

    y_ref = layer_norm_reference(x, gamma, beta)
    assert y.shape == x.shape
    assert jnp.allclose(y, y_ref, atol=1e-5, rtol=1e-5), "mismatch vs reference"

    print("KERNEL_OK")
</pallas_src>

<mosaic_0001>
module attributes {stable_mosaic.version = 11 : i64} {
  func.func @kernel(%arg0: i32, %arg1: memref<4x128xf32, #tpu.memory_space<vmem>>, %arg2: memref<1x128xf32, #tpu.memory_space<vmem>>, %arg3: memref<1x128xf32, #tpu.memory_space<vmem>>, %arg4: memref<128x128xbf16, #tpu.memory_space<vmem>>, %arg5: memref<4x128xf32, #tpu.memory_space<vmem>>) attributes {dimension_semantics = [#tpu.dimension_semantics<parallel>], iteration_bounds = array<i64: 1>, scalar_prefetch = 0 : i64, scratch_operands = 0 : i64, tpu.core_type = #tpu.core_type<tc>, window_params = [{transform_indices = @transform_0, window_bounds = array<i64: 4, 128>}, {pipeline_mode = #tpu.pipeline_mode<synchronous>, transform_indices = @transform_1, window_bounds = array<i64: 1, 128>}, {pipeline_mode = #tpu.pipeline_mode<synchronous>, transform_indices = @transform_2, window_bounds = array<i64: 1, 128>}, {pipeline_mode = #tpu.pipeline_mode<synchronous>, transform_indices = @transform_3, window_bounds = array<i64: 128, 128>}, {transform_indices = @transform_4, window_bounds = array<i64: 4, 128>}]} {
    %c0 = arith.constant 0 : index
    %c0_0 = arith.constant 0 : index
    %0 = vector.load %arg1[%c0, %c0_0] : memref<4x128xf32, #tpu.memory_space<vmem>>, vector<4x128xf32>
    %c0_1 = arith.constant 0 : index
    %c0_2 = arith.constant 0 : index
    %1 = vector.load %arg4[%c0_1, %c0_2] : memref<128x128xbf16, #tpu.memory_space<vmem>>, vector<128x128xbf16>
    %2 = arith.truncf %0 : vector<4x128xf32> to vector<4x128xbf16>
    %3 = arith.extf %2 : vector<4x128xbf16> to vector<4x128xf32>
    %4 = arith.subf %0, %3 : vector<4x128xf32>
    %5 = arith.truncf %4 : vector<4x128xf32> to vector<4x128xbf16>
    %cst = arith.constant dense<0.000000e+00> : vector<4x128xf32>
    %6 = tpu.matmul %2, %1, %cst {dimension_numbers = #tpu.dot_dimension_numbers<[1], [0], [0], [1], [0, 0, 1, 1], [], []>} : vector<4x128xbf16>, vector<128x128xbf16>, vector<4x128xf32> -> vector<4x128xf32>
    %cst_3 = arith.constant dense<0.000000e+00> : vector<4x128xf32>
    %7 = tpu.matmul %5, %1, %cst_3 {dimension_numbers = #tpu.dot_dimension_numbers<[1], [0], [0], [1], [0, 0, 1, 1], [], []>} : vector<4x128xbf16>, vector<128x128xbf16>, vector<4x128xf32> -> vector<4x128xf32>
    %8 = arith.addf %6, %7 : vector<4x128xf32>
    %cst_4 = arith.constant 3.125000e-02 : f32
    %9 = vector.broadcast %cst_4 : f32 to vector<4x128xf32>
    %10 = arith.mulf %8, %9 : vector<4x128xf32>
    %11 = arith.subf %0, %10 : vector<4x128xf32>
    %12 = arith.mulf %11, %11 : vector<4x128xf32>
    %13 = arith.truncf %12 : vector<4x128xf32> to vector<4x128xbf16>
    %14 = arith.extf %13 : vector<4x128xbf16> to vector<4x128xf32>
    %15 = arith.subf %12, %14 : vector<4x128xf32>
    %16 = arith.truncf %15 : vector<4x128xf32> to vector<4x128xbf16>
    %cst_5 = arith.constant dense<0.000000e+00> : vector<4x128xf32>
    %17 = tpu.matmul %13, %1, %cst_5 {dimension_numbers = #tpu.dot_dimension_numbers<[1], [0], [0], [1], [0, 0, 1, 1], [], []>} : vector<4x128xbf16>, vector<128x128xbf16>, vector<4x128xf32> -> vector<4x128xf32>
    %cst_6 = arith.constant dense<0.000000e+00> : vector<4x128xf32>
    %18 = tpu.matmul %16, %1, %cst_6 {dimension_numbers = #tpu.dot_dimension_numbers<[1], [0], [0], [1], [0, 0, 1, 1], [], []>} : vector<4x128xbf16>, vector<128x128xbf16>, vector<4x128xf32> -> vector<4x128xf32>
    %19 = arith.addf %17, %18 : vector<4x128xf32>
    %cst_7 = arith.constant 0.0322580636 : f32
    %20 = vector.broadcast %cst_7 : f32 to vector<4x128xf32>
    %21 = arith.mulf %19, %20 : vector<4x128xf32>
    %22 = math.sqrt %21 : vector<4x128xf32>
    %cst_8 = arith.constant 9.99999997E-7 : f32
    %23 = vector.broadcast %cst_8 : f32 to vector<4x128xf32>
    %24 = arith.addf %22, %23 : vector<4x128xf32>
    %25 = tpu.reciprocal %24 : vector<4x128xf32> -> vector<4x128xf32>
    %c0_9 = arith.constant 0 : index
    %c0_10 = arith.constant 0 : index
    %26 = vector.load %arg2[%c0_9, %c0_10] : memref<1x128xf32, #tpu.memory_space<vmem>>, vector<1x128xf32>
    %27 = arith.mulf %11, %25 : vector<4x128xf32>
    %28 = vector.broadcast %26 : vector<1x128xf32> to vector<4x128xf32>
    %29 = arith.mulf %28, %27 : vector<4x128xf32>
    %c0_11 = arith.constant 0 : index
    %c0_12 = arith.constant 0 : index
    %30 = vector.load %arg3[%c0_11, %c0_12] : memref<1x128xf32, #tpu.memory_space<vmem>>, vector<1x128xf32>
    %31 = vector.broadcast %30 : vector<1x128xf32> to vector<4x128xf32>
    %32 = arith.addf %29, %31 : vector<4x128xf32>
    %c0_13 = arith.constant 0 : index
    %c0_14 = arith.constant 0 : index
    %33 = vector.load %arg5[%c0_13, %c0_14] : memref<4x128xf32, #tpu.memory_space<vmem>>, vector<4x128xf32>
    tpu.vector_store %arg5[%c0_13, %c0_14], %32 {strides = array<i32>} : memref<4x128xf32, #tpu.memory_space<vmem>>, vector<4x128xf32>,
    return
  }
  func.func @transform_0(%arg0: i32) -> (i32, i32) {
    %c0_i32 = arith.constant 0 : i32
    %c0_i32_0 = arith.constant 0 : i32
    return %arg0, %c0_i32 : i32, i32
  }
  func.func @transform_1(%arg0: i32) -> (i32, i32) {
    %c0_i32 = arith.constant 0 : i32
    %c0_i32_0 = arith.constant 0 : i32
    %c0_i32_1 = arith.constant 0 : i32
    return %c0_i32, %c0_i32_0 : i32, i32
  }
  func.func @transform_2(%arg0: i32) -> (i32, i32) {
    %c0_i32 = arith.constant 0 : i32
    %c0_i32_0 = arith.constant 0 : i32
    %c0_i32_1 = arith.constant 0 : i32
    return %c0_i32, %c0_i32_0 : i32, i32
  }
  func.func @transform_3(%arg0: i32) -> (i32, i32) {
    %c0_i32 = arith.constant 0 : i32
    %c0_i32_0 = arith.constant 0 : i32
    %c0_i32_1 = arith.constant 0 : i32
    return %c0_i32, %c0_i32_0 : i32, i32
  }
  func.func @transform_4(%arg0: i32) -> (i32, i32) {
    %c0_i32 = arith.constant 0 : i32
    %c0_i32_0 = arith.constant 0 : i32
    return %arg0, %c0_i32 : i32, i32
  }
}

</mosaic_0001>

<bundles_post_ra>
// kernel: tpu_custom_call.1
= control target key start
LH: loop header
LB: loop body
LE: loop exit
PB: predicated region body
PF: predicated region fallthrough
CT: control target
= control target key end

     0   :  { %9 = vsyncpa [#allocation3], 0  ;;  %s629_s0 = inlined_call_operand.hbm [shape: f32[4,128], index: 0, kind: input, shape index: {}]   ;;  %s630_s1 = inlined_call_operand.vmem [shape: f32[1,128], index: 1, kind: input, shape index: {}]   ;;  %s631_s2 = inlined_call_operand.vmem [shape: f32[1,128], index: 2, kind: input, shape index: {}]   ;;  %s632_s3 = inlined_call_operand.hbm [shape: bf16[128,128], index: 3, kind: input, shape index: {}]   ;;  %s633_s4 = inlined_call_operand.hbm [shape: f32[4,128], index: 4, kind: output, shape index: {}]  }
   0x1   :  { %10 = vsyncpa [#allocation6], 0 }
   0x2   :  { %11 = vsyncpa [#allocation4], 0  ;;  %s536_s15 = smov [#allocation2]   ;;  %s537_s17 = smov [#allocation5]  }
   0x3   :  { %s18_s16 = sshll.u32 %s536_s15, 4  ;;  %s31_s18 = sshll.u32 %s537_s17, 4  ;;  %s19_s16 = int_to_ptr.vmem [resolvable:$true] %s18_s16  ;;  %s32_s18 = int_to_ptr.vmem [resolvable:$true] %s31_s18 }
   0x4   :  { %s478_s19 = scalar_lea.vmem %s19_s16, 64  ;;  %p483_p1 = scmp.lt.s32.totalorder %s19_s16, %s19_s16 }
   0x5   :  { %p479_p0 = scmp.ne.s32.totalorder %s19_s16, %s478_s19  ;;  %p484_p2 = scmp.lt.s32.totalorder %s478_s19, %s478_s19 }
   0x7   :  { %p485_p3 = por %p484_p2, %p483_p1 }
   0x9   :  { %p486_p4 = pnand %p485_p3, %p479_p0 }
   0xb   :  { %489 = shalt.err (!%p486_p4)
}
   0xc   :  { %21 = dma.hbm_to_vmem [thread:$0]  %s629_s0, 64, %s19_s16, [#allocation3]  }
   0xd   :  { %s498_s22 = scalar_lea.vmem %s32_s18, 1024  ;;  %p503_p6 = scmp.lt.s32.totalorder %s32_s18, %s32_s18 }
   0xe   :  { %p499_p5 = scmp.ne.s32.totalorder %s32_s18, %s498_s22  ;;  %p504_p7 = scmp.lt.s32.totalorder %s498_s22, %s498_s22 }
  0x10   :  { %p505_p8 = por %p504_p7, %p503_p6 }
  0x12   :  { %p506_p9 = pnand %p505_p8, %p499_p5 }
  0x14   :  { %509 = shalt.err (!%p506_p9)
}
  0x15   :  { %s538_s23 = smov 64   ;;  %s539_s24 = smov 4  }
  0x16   :  { %37 = dma.hbm_to_vmem [thread:$0]  %s632_s3, 1024, %s32_s18, [#allocation6], %s538_s23, %s538_s23, %s539_s24  }
  0x17   :  { %530 = dma.done.wait [#allocation3], 64  }
  0x18   :  { %531 = vsyncadd [#allocation3], 4294967232 }
  0x19   :  { %532 = dma.done.wait [#allocation6], 1024  }
  0x1a   :  { %533 = vsyncadd [#allocation6], 4294966272  ;;  %v540_v0 = vmov 0.0   ;;  %vm541_vm0 = vmmov 0   ;;  %v458_v1 = vld [vmem:[#allocation5 + $0x38] sm:$0xff]   ;;  %v459_v2 = vld [vmem:[#allocation5 + $0x30] sm:$0xff]  }
  0x1b   :  { %371 = vmatprep.subr.bf16.mxu0 %v540_v0  ;;  %391 = vmatprep.subr.bf16.mxu1 %v540_v0  ;;  %v460_v3 = vld [vmem:[#allocation5 + $0x28] sm:$0xff]   ;;  %v461_v4 = vld [vmem:[#allocation5 + $0x20] sm:$0xff]   ;;  %v462_v5 = vld [vmem:[#allocation5 + $0x18] sm:$0xff]   ;;  %s542_s29 = smov [#allocation7]  }
  0x1c   :  { %387 = vmatprep.mubr.msk.bf16.mxu0 %vm541_vm0, %v540_v0  ;;  %407 = vmatprep.mubr.msk.bf16.mxu1 %vm541_vm0, %v540_v0  ;;  %v586_v6 = vld [vmem:[#allocation2] sm:$0xf]  ;;  %v463_v8 = vld [vmem:[#allocation5 + $0x10] sm:$0xff]   ;;  %v464_v10 = vld [vmem:[#allocation5 + $0x8] sm:$0xff]   ;;  %s315_s30 = sshll.u32 %s542_s29, 4  ;;  %s316_s30 = int_to_ptr.vmem [resolvable:$true] %s315_s30 }
  0x1d   :  { %372 = vmatpush3.bf16.msra.mxu0 %v458_v1  ;;  %392 = vmatpush3.bf16.msra.mxu1 %v458_v1  ;;  %v62_v7 = vpack.c.bf16 %v586_v6, %v586_v6  ;;  %v465_v12 = vld [vmem:[#allocation5] sm:$0xff]   ;;  %v333_v47 = vld [vmem:[%s630_s1] ss:$0 sm:$0xff]  ;;  %s510_s5 = scalar_lea.vmem %s316_s30, 64  ;;  %p515_p11 = scmp.lt.s32.totalorder %s316_s30, %s316_s30 }
  0x1e   :  { %373 = vmatprep.subr.bf16.mxu0 %v540_v0  ;;  %393 = vmatprep.subr.bf16.mxu1 %v540_v0  ;;  %v334_v49 = vld [vmem:[%s631_s2] ss:$0 sm:$0xff]  ;;  %p511_p10 = scmp.ne.s32.totalorder %s316_s30, %s510_s5  ;;  %p516_p12 = scmp.lt.s32.totalorder %s510_s5, %s510_s5 }
  0x1f   :  { %v63_v9 = vunpack.c.l.bf16 %v62_v7 }
  0x20   :  { %p517_p13 = por %p516_p12, %p515_p11 }
  0x21   :  { %374 = vmatpush3.bf16.msra.mxu0 %v459_v2  ;;  %394 = vmatpush3.bf16.msra.mxu1 %v459_v2  ;;  %v64_v11 = vsub.f32 %v586_v6, %v63_v9 }
  0x22   :  { %375 = vmatprep.subr.bf16.mxu0 %v540_v0  ;;  %395 = vmatprep.subr.bf16.mxu1 %v540_v0  ;;  %p518_p0 = pnand %p517_p13, %p511_p10 }
  0x23   :  { %v65_v13 = vpack.c.bf16 %v64_v11, %v64_v11 }
  0x25   :  { %376 = vmatpush3.bf16.msra.mxu0 %v460_v3  ;;  %396 = vmatpush3.bf16.msra.mxu1 %v460_v3 }
  0x26   :  { %377 = vmatprep.subr.bf16.mxu0 %v540_v0  ;;  %397 = vmatprep.subr.bf16.mxu1 %v540_v0 }
  0x29   :  { %378 = vmatpush3.bf16.msra.mxu0 %v461_v4  ;;  %398 = vmatpush3.bf16.msra.mxu1 %v461_v4 }
  0x2a   :  { %379 = vmatprep.subr.bf16.mxu0 %v540_v0  ;;  %399 = vmatprep.subr.bf16.mxu1 %v540_v0 }
  0x2d   :  { %380 = vmatpush3.bf16.msra.mxu0 %v462_v5  ;;  %400 = vmatpush3.bf16.msra.mxu1 %v462_v5 }
  0x2e   :  { %381 = vmatprep.subr.bf16.mxu0 %v540_v0  ;;  %401 = vmatprep.subr.bf16.mxu1 %v540_v0 }
  0x31   :  { %382 = vmatpush3.bf16.msra.mxu0 %v463_v8  ;;  %402 = vmatpush3.bf16.msra.mxu1 %v463_v8 }
  0x32   :  { %383 = vmatprep.subr.bf16.mxu0 %v540_v0  ;;  %403 = vmatprep.subr.bf16.mxu1 %v540_v0 }
  0x35   :  { %384 = vmatpush3.bf16.msra.mxu0 %v464_v10  ;;  %404 = vmatpush3.bf16.msra.mxu1 %v464_v10 }
  0x36   :  { %385 = vmatprep.subr.bf16.mxu0 %v540_v0  ;;  %405 = vmatprep.subr.bf16.mxu1 %v540_v0 }
  0x39   :  { %386 = vmatpush3.bf16.msra.mxu0 %v465_v12  ;;  %406 = vmatpush3.bf16.msra.mxu1 %v465_v12 }
  0x3a   :  { %431 = vmatprep.subr.bf16.mxu1 %v540_v0  ;;  %411 = vmatprep.subr.bf16.mxu0 %v540_v0 }
  0x3c   :  { %388 = vmatmul.mubr.bf16.vlgmr.msra.gmra.mxu0 %v65_v13  ;;  %408 = vmatmul.mubr.bf16.vlgmr.msra.gmra.mxu1 %v62_v7 }
  0x3d   :  { %432 = vmatpush3.bf16.msra.mxu1 %v458_v1  ;;  %412 = vmatpush3.bf16.msra.mxu0 %v458_v1 }
  0x3e   :  { %433 = vmatprep.subr.bf16.mxu1 %v540_v0  ;;  %413 = vmatprep.subr.bf16.mxu0 %v540_v0 }
  0x3f   :  { %447 = vmatprep.mubr.msk.bf16.mxu1 %vm541_vm0, %v540_v0  ;;  %427 = vmatprep.mubr.msk.bf16.mxu0 %vm541_vm0, %v540_v0 }
  0x41   :  { %434 = vmatpush3.bf16.msra.mxu1 %v459_v2  ;;  %414 = vmatpush3.bf16.msra.mxu0 %v459_v2 }
  0x42   :  { %435 = vmatprep.subr.bf16.mxu1 %v540_v0  ;;  %415 = vmatprep.subr.bf16.mxu0 %v540_v0 }
  0x45   :  { %436 = vmatpush3.bf16.msra.mxu1 %v460_v3  ;;  %416 = vmatpush3.bf16.msra.mxu0 %v460_v3 }
  0x46   :  { %437 = vmatprep.subr.bf16.mxu1 %v540_v0  ;;  %417 = vmatprep.subr.bf16.mxu0 %v540_v0 }
  0x49   :  { %438 = vmatpush3.bf16.msra.mxu1 %v461_v4  ;;  %418 = vmatpush3.bf16.msra.mxu0 %v461_v4 }
  0x4a   :  { %439 = vmatprep.subr.bf16.mxu1 %v540_v0  ;;  %419 = vmatprep.subr.bf16.mxu0 %v540_v0 }
  0x4d   :  { %440 = vmatpush3.bf16.msra.mxu1 %v462_v5  ;;  %420 = vmatpush3.bf16.msra.mxu0 %v462_v5 }
  0x4e   :  { %441 = vmatprep.subr.bf16.mxu1 %v540_v0  ;;  %421 = vmatprep.subr.bf16.mxu0 %v540_v0 }
  0x51   :  { %442 = vmatpush3.bf16.msra.mxu1 %v463_v8  ;;  %422 = vmatpush3.bf16.msra.mxu0 %v463_v8 }
  0x52   :  { %443 = vmatprep.subr.bf16.mxu1 %v540_v0  ;;  %423 = vmatprep.subr.bf16.mxu0 %v540_v0 }
  0x55   :  { %444 = vmatpush3.bf16.msra.mxu1 %v464_v10  ;;  %424 = vmatpush3.bf16.msra.mxu0 %v464_v10 }
  0x56   :  { %445 = vmatprep.subr.bf16.mxu1 %v540_v0  ;;  %425 = vmatprep.subr.bf16.mxu0 %v540_v0 }
  0x59   :  { %446 = vmatpush3.bf16.msra.mxu1 %v465_v12  ;;  %426 = vmatpush3.bf16.msra.mxu0 %v465_v12 }
  0xfc   :  { %v148_v14 = vpop.f32.mrf.mxu0  ;;  %v188_v15 = vpop.f32.mrf.mxu1 }
  0xfd   :  { %v189_v16 = vadd.f32 %v188_v15, %v148_v14 }
  0xfe   :  { %v389_v17 = vpop.f32.mrf.mxu0  ;;  %v409_v18 = vpop.f32.mrf.mxu1 }
  0xff   :  { %v194_v19 = vmul.f32 0.03125, %v189_v16 }
 0x100   :  { %v151_v20 = vpop.f32.mrf.mxu0  ;;  %v191_v21 = vpop.f32.mrf.mxu1 }
 0x101   :  { %v195_v22 = vsub.f32 %v586_v6, %v194_v19 }
 0x102   :  { %v390_v23 = vpop.f32.mrf.mxu0  ;;  %v410_v24 = vpop.f32.mrf.mxu1 }
 0x103   :  { %v196_v25 = vmul.f32 %v195_v22, %v195_v22 }
 0x105   :  { %v197_v26 = vpack.c.bf16 %v196_v25, %v196_v25 }
 0x107   :  { %v198_v27 = vunpack.c.l.bf16 %v197_v26  ;;  %448 = vmatmul.mubr.bf16.vlgmr.msra.gmra.mxu1 %v197_v26 }
 0x109   :  { %v199_v28 = vsub.f32 %v196_v25, %v198_v27 }
 0x10b   :  { %v200_v29 = vpack.c.bf16 %v199_v28, %v199_v28 }
 0x10d   :  { %428 = vmatmul.mubr.bf16.vlgmr.msra.gmra.mxu0 %v200_v29 }
 0x1c7   :  { %v275_v30 = vpop.f32.mrf.mxu1 }
 0x1c9   :  { %v449_v31 = vpop.f32.mrf.mxu1 }
 0x1cb   :  { %v278_v32 = vpop.f32.mrf.mxu1 }
 0x1cd   :  { %v235_v33 = vpop.f32.mrf.mxu0  ;;  %v450_v34 = vpop.f32.mrf.mxu1 }
 0x1ce   :  { %v276_v35 = vadd.f32 %v275_v30, %v235_v33 }
 0x1cf   :  { %v429_v36 = vpop.f32.mrf.mxu0 }
 0x1d0   :  { %v281_v37 = vmul.f32 0.032258064, %v276_v35 }
 0x1d1   :  { %v238_v38 = vpop.f32.mrf.mxu0 }
 0x1d2   :  { %466 = vrsqrt.f32 %v281_v37  ;;  %vm284_vm1 = vcmp.eq.f32.partialorder %v281_v37, inf  ;;  %v287_v42 = vand.u32 2147483648, %v281_v37  ;;  %vm286_vm2 = vcmp.eq.f32.partialorder %v281_v37, 0.0 }
 0x1d3   :  { %v430_v39 = vpop.f32.mrf.mxu0 }
 0x1df   :  { %v467_v40 = vpop.eup %466 }
 0x1e0   :  { %v283_v41 = vmul.f32 %v467_v40, %v281_v37 }
 0x1e2   :  { %v285_v43 = vsel %vm284_vm1, %v281_v37, %v283_v41 }
 0x1e3   :  { %v288_v44 = vsel %vm286_vm2, %v287_v42, %v285_v43 }
 0x1e4   :  { %v289_v45 = vadd.f32 1e-06, %v288_v44 }
 0x1e6   :  { %468 = vrcp.f32 %v289_v45 }
 0x1f3   :  { %v469_v46 = vpop.eup %468 }
 0x1f4   :  { %v292_v48 = vmul.f32 %v469_v46, %v195_v22 }
 0x1f6   :  { %v299_v50 = vmul.f32 %v333_v47, %v292_v48 }
 0x1f8   :  { %v307_v51 = vadd.f32 %v334_v49, %v299_v50 }
 0x1fa   :  { %308 = vst [vmem:[#allocation7] sm:$0xf] %v307_v51 }
 0x1fb   :  { %521 = shalt.err (!%p518_p0)
}
 0x1fc   :  { %318 = dma.vmem_to_hbm [thread:$0]  %s316_s30, 64, %s633_s4, [#allocation4]  }
 0x1fd   :  { %534 = dma.done.wait [#allocation4], 64  }
 0x1fe   :  { %535 = vsyncadd [#allocation4], 4294967232 }
 0x1ff   :  { %322 = vsyncpa [#allocation3], 1 }
 0x200   :  { %323 = vsyncpa [#allocation6], 1 }
 0x201   :  { %324 = vsyncpa [#allocation4], 1 }

</bundles_post_ra>
